<compile_context>
chip_gen: v6e
topology: v6e:2x2x1
jax: 0.10.0
libtpu: 0.0.40
codegen_flags: <defaults>
</compile_context>

<pallas_src>
import functools

import jax
import jax.numpy as jnp
from jax.experimental import pallas as pl
from jax.experimental.pallas import tpu as pltpu

LANE = 128                          # lane-dense padding granularity
MAX_TILE_NODES = 512                # upper bound on the row tile
VMEM_LIMIT = 32 * 1024 * 1024       # safe on v5e/v6e/v7x for these tile sizes


def _round_up(x, m):
    return ((x + m - 1) // m) * m


def _pick_tile(n_pad, max_tile=MAX_TILE_NODES):
    """Largest multiple of 128 that is <= max_tile and divides n_pad."""
    t = min(max_tile, n_pad)
    t = (t // LANE) * LANE
    while t > LANE and n_pad % t != 0:
        t -= LANE
    return max(t, LANE)


def _pad2(x, rows, cols):
    return jnp.pad(x, ((0, rows - x.shape[0]), (0, cols - x.shape[1])))


# --------------- projection kernel:  Z = H @ [W_self | W_neigh] -------------------

def _proj_kernel(h_ref, wcat_ref, b_ref, pself_ref, pneigh_ref, *, o_pad):
    # One fused GEMM for both the self and neighbor projections (shared LHS).
    z = jnp.dot(h_ref[...], wcat_ref[...], preferred_element_type=jnp.float32)
    pself_ref[...] = (z[:, :o_pad] + b_ref[...]).astype(pself_ref.dtype)   # bias folded in
    pneigh_ref[...] = z[:, o_pad:].astype(pneigh_ref.dtype)


# ------- aggregation kernel:  out = P_self + inv_deg * (adj01 @ P_neigh) (+ReLU) --------

def _agg_kernel(a_ref, pn_ref, pself_ref, invdeg_ref, o_ref, *, apply_relu):
    # a_ref: (tm, n_pad) int8 0/1 tile -> cast to bf16 in-VMEM (HBM traffic stays int8).
    neigh = jnp.dot(a_ref[...].astype(jnp.bfloat16), pn_ref[...],
                    preferred_element_type=jnp.float32)
    out = pself_ref[...].astype(jnp.float32) + invdeg_ref[...] * neigh
    if apply_relu:
        out = jnp.maximum(out, 0.0)
    o_ref[...] = out.astype(o_ref.dtype)


def sage_layer(a_pad, invdeg_pad, h_pad, w_cat, bias_pad, *, apply_relu, out_dtype):
    """One SAGE layer on padded inputs.

    a_pad     : (n_pad, n_pad)   int8 0/1 adjacency (dst rows, src cols), zero padded
    invdeg_pad: (n_pad, 1)       f32 per-destination 1/in_deg (0 for isolated/pad rows)
    h_pad     : (n_pad, f_pad)   bf16 node features
    w_cat     : (f_pad, 2*o_pad) bf16  == [W_self | W_neigh]
    bias_pad  : (1, o_pad)       f32
    """
    n_pad, f_pad = h_pad.shape
    o_pad = w_cat.shape[1] // 2
    tm = _pick_tile(n_pad)
    out_bytes = jnp.dtype(out_dtype).itemsize

    # ---- projection (reassociation): P_self = bf16(H@Ws + b), P_neigh = bf16(H@Wn) ----
    p_self, p_neigh = pl.pallas_call(
        functools.partial(_proj_kernel, o_pad=o_pad),
        out_shape=(jax.ShapeDtypeStruct((n_pad, o_pad), jnp.bfloat16),
                   jax.ShapeDtypeStruct((n_pad, o_pad), jnp.bfloat16)),
        grid=(n_pad // tm,),
        in_specs=[
            pl.BlockSpec((tm, f_pad), lambda i: (i, 0)),
            pl.BlockSpec((f_pad, 2 * o_pad), lambda i: (0, 0)),   # weights resident
            pl.BlockSpec((1, o_pad), lambda i: (0, 0)),
        ],
        out_specs=(pl.BlockSpec((tm, o_pad), lambda i: (i, 0)),
                   pl.BlockSpec((tm, o_pad), lambda i: (i, 0))),
        compiler_params=pltpu.CompilerParams(
            dimension_semantics=("parallel",),
            vmem_limit_bytes=VMEM_LIMIT),
        cost_estimate=pl.CostEstimate(
            flops=2 * n_pad * f_pad * 2 * o_pad,
            transcendentals=0,
            bytes_accessed=(n_pad * f_pad * 2 + f_pad * 2 * o_pad * 2
                            + n_pad * o_pad * 4 + o_pad * 4)),
    )(h_pad, w_cat, bias_pad)

    # ---- aggregation: out = P_self + inv_deg * (adj01 @ P_neigh) ----------------------
    # Single grid axis over row tiles; full-K dot per step with a resident P_neigh.
    out = pl.pallas_call(
        functools.partial(_agg_kernel, apply_relu=apply_relu),
        out_shape=jax.ShapeDtypeStruct((n_pad, o_pad), out_dtype),
        grid=(n_pad // tm,),
        in_specs=[
            pl.BlockSpec((tm, n_pad), lambda i: (i, 0)),      # A row tile, full K (int8)
            pl.BlockSpec((n_pad, o_pad), lambda i: (0, 0)),   # P_neigh fully resident
            pl.BlockSpec((tm, o_pad), lambda i: (i, 0)),      # P_self tile (bf16)
            pl.BlockSpec((tm, 1), lambda i: (i, 0)),          # inv_deg per row (f32)
        ],
        out_specs=pl.BlockSpec((tm, o_pad), lambda i: (i, 0)),
        compiler_params=pltpu.CompilerParams(
            dimension_semantics=("parallel",),                # node axis -> both TCs on v7x
            vmem_limit_bytes=VMEM_LIMIT),
        cost_estimate=pl.CostEstimate(
            flops=2 * n_pad * n_pad * o_pad,
            transcendentals=0,
            bytes_accessed=(n_pad * n_pad * 1                 # int8 adjacency, read once
                            + n_pad * o_pad * 2               # resident P_neigh, read once
                            + n_pad * o_pad * 2               # P_self
                            + n_pad * 4                       # inv_deg
                            + n_pad * o_pad * out_bytes)),
    )(a_pad, p_neigh, p_self, invdeg_pad)
    return out


def init_linear(key, in_feat, out_feat):
    """torch.nn.Linear(2*in_feat, out_feat) default init, split/transposed into
    W_self = W[:, :in_feat].T and W_neigh = W[:, in_feat:].T (each (in_feat, out_feat))."""
    kw, kb = jax.random.split(key)
    fan_in = 2 * in_feat
    bound = 1.0 / jnp.sqrt(fan_in)
    w = jax.random.uniform(kw, (out_feat, fan_in), jnp.float32, -bound, bound)
    b = jax.random.uniform(kb, (out_feat,), jnp.float32, -bound, bound)
    return w[:, :in_feat].T, w[:, in_feat:].T, b


def model_forward(adj01, feature, params):
    """Two SAGE layers (conv1 + ReLU + conv2), matching Model.forward."""
    n = feature.shape[0]
    n_pad = _round_up(n, LANE)                      # pad granularity decoupled from tile

    deg = adj01.sum(axis=1, keepdims=True)          # row = destination, in-degree
    inv_deg = jnp.where(deg > 0, 1.0 / jnp.maximum(deg, 1.0), 0.0).astype(jnp.float32)

    a_pad = _pad2(adj01, n_pad, n_pad).astype(jnp.int8)            # exact 0/1
    invdeg_pad = jnp.pad(inv_deg, ((0, n_pad - n), (0, 0)))

    h = feature
    n_layers = len(params)
    for li, (w_self, w_neigh, b) in enumerate(params):
        f_in, f_out = w_self.shape
        f_pad = _round_up(f_in, LANE)
        o_pad = _round_up(f_out, LANE)
        h_pad = _pad2(h, n_pad, f_pad).astype(jnp.bfloat16)
        w_cat = jnp.concatenate(
            [_pad2(w_self, f_pad, o_pad), _pad2(w_neigh, f_pad, o_pad)],
            axis=1).astype(jnp.bfloat16)
        b_pad = jnp.pad(b, (0, o_pad - f_out)).reshape(1, o_pad).astype(jnp.float32)
        last = (li == n_layers - 1)
        # Intermediate activation stays padded + bf16 (lane-dense, cheap HBM round trip).
        h = sage_layer(a_pad, invdeg_pad, h_pad, w_cat, b_pad,
                       apply_relu=not last,
                       out_dtype=jnp.float32 if last else jnp.bfloat16)
    num_classes = params[-1][0].shape[1]
    return h[:n, :num_classes]


def reference_forward(adj01, feature, params):
    """Pure-JAX reference with matching precision (bf16 matmul inputs, f32 accumulate,
    deferred 1/deg scaling)."""
    bf = jnp.bfloat16
    deg = adj01.sum(axis=1, keepdims=True)
    inv_deg = jnp.where(deg > 0, 1.0 / jnp.maximum(deg, 1.0), 0.0).astype(jnp.float32)
    a_bf = adj01.astype(bf)                         # 0/1, exact
    h = feature
    n_layers = len(params)
    for li, (w_self, w_neigh, b) in enumerate(params):
        hb = h.astype(bf)
        p_self = (jnp.dot(hb, w_self.astype(bf),
                          preferred_element_type=jnp.float32) + b).astype(bf)
        p_neigh = jnp.dot(hb, w_neigh.astype(bf),
                          preferred_element_type=jnp.float32).astype(bf)
        h_n = inv_deg * jnp.dot(a_bf, p_neigh, preferred_element_type=jnp.float32)
        out = p_self.astype(jnp.float32) + h_n
        if li != n_layers - 1:
            out = jnp.maximum(out, 0.0)
        h = out
    return h


if __name__ == "__main__":
    # Small synthetic graph standing in for the Cora graph.
    N = 1000             # nodes (pads to 1024 -> 2 row tiles of 512, exercises the grid)
    in_feats = 64
    h_feats = 32
    num_classes = 8

    key = jax.random.PRNGKey(0)
    k_adj, k_feat, k_l1, k_l2 = jax.random.split(key, 4)

    # Deterministic random directed graph (no self loops), dense 0/1 adjacency.
    adj = (jax.random.uniform(k_adj, (N, N)) < 0.02).astype(jnp.float32)
    adj = adj * (1.0 - jnp.eye(N, dtype=jnp.float32))

    feature = jax.random.normal(k_feat, (N, in_feats), jnp.float32)

    params = (
        init_linear(k_l1, in_feats, h_feats),
        init_linear(k_l2, h_feats, num_classes),
    )

    out = jax.block_until_ready(model_forward(adj, feature, params))
    ref = reference_forward(adj, feature, params)

    assert out.shape == (N, num_classes)
    max_err = float(jnp.max(jnp.abs(out - ref)))
    assert jnp.allclose(out, ref, atol=2e-2, rtol=2e-2), max_err

    print("KERNEL_OK")
</pallas_src>

<mosaic_0001>
module attributes {stable_mosaic.version = 11 : i64} {
  func.func @_proj_kernel(%arg0: i32, %arg1: memref<512x128xbf16, #tpu.memory_space<vmem>>, %arg2: memref<128x256xbf16, #tpu.memory_space<vmem>>, %arg3: memref<1x128xf32, #tpu.memory_space<vmem>>, %arg4: memref<512x128xbf16, #tpu.memory_space<vmem>>, %arg5: memref<512x128xbf16, #tpu.memory_space<vmem>>) attributes {dimension_semantics = [#tpu.dimension_semantics<parallel>], iteration_bounds = array<i64: 2>, scalar_prefetch = 0 : i64, scratch_operands = 0 : i64, tpu.core_type = #tpu.core_type<tc>, window_params = [{transform_indices = @transform_0, window_bounds = array<i64: 512, 128>}, {pipeline_mode = #tpu.pipeline_mode<synchronous>, transform_indices = @transform_1, window_bounds = array<i64: 128, 256>}, {pipeline_mode = #tpu.pipeline_mode<synchronous>, transform_indices = @transform_2, window_bounds = array<i64: 1, 128>}, {transform_indices = @transform_3, window_bounds = array<i64: 512, 128>}, {transform_indices = @transform_4, window_bounds = array<i64: 512, 128>}]} {
    %c0 = arith.constant 0 : index
    %c0_0 = arith.constant 0 : index
    %0 = vector.load %arg1[%c0, %c0_0] : memref<512x128xbf16, #tpu.memory_space<vmem>>, vector<512x128xbf16>
    %c0_1 = arith.constant 0 : index
    %c0_2 = arith.constant 0 : index
    %1 = vector.load %arg2[%c0_1, %c0_2] : memref<128x256xbf16, #tpu.memory_space<vmem>>, vector<128x256xbf16>
    %cst = arith.constant dense<0.000000e+00> : vector<512x256xf32>
    %2 = tpu.matmul %0, %1, %cst {dimension_numbers = #tpu.dot_dimension_numbers<[1], [0], [0], [1], [0, 0, 1, 1], [], []>} : vector<512x128xbf16>, vector<128x256xbf16>, vector<512x256xf32> -> vector<512x256xf32>
    %3 = vector.extract_strided_slice %2 {offsets = [0, 0], sizes = [512, 128], strides = [1, 1]} : vector<512x256xf32> to vector<512x128xf32>
    %c0_3 = arith.constant 0 : index
    %c0_4 = arith.constant 0 : index
    %4 = vector.load %arg3[%c0_3, %c0_4] : memref<1x128xf32, #tpu.memory_space<vmem>>, vector<1x128xf32>
    %5 = vector.broadcast %4 : vector<1x128xf32> to vector<512x128xf32>
    %6 = arith.addf %3, %5 : vector<512x128xf32>
    %7 = arith.truncf %6 : vector<512x128xf32> to vector<512x128xbf16>
    %c0_5 = arith.constant 0 : index
    %c0_6 = arith.constant 0 : index
    %8 = vector.load %arg4[%c0_5, %c0_6] : memref<512x128xbf16, #tpu.memory_space<vmem>>, vector<512x128xbf16>
    tpu.vector_store %arg4[%c0_5, %c0_6], %7 {strides = array<i32>} : memref<512x128xbf16, #tpu.memory_space<vmem>>, vector<512x128xbf16>,
    %9 = vector.extract_strided_slice %2 {offsets = [0, 128], sizes = [512, 128], strides = [1, 1]} : vector<512x256xf32> to vector<512x128xf32>
    %10 = arith.truncf %9 : vector<512x128xf32> to vector<512x128xbf16>
    %c0_7 = arith.constant 0 : index
    %c0_8 = arith.constant 0 : index
    %11 = vector.load %arg5[%c0_7, %c0_8] : memref<512x128xbf16, #tpu.memory_space<vmem>>, vector<512x128xbf16>
    tpu.vector_store %arg5[%c0_7, %c0_8], %10 {strides = array<i32>} : memref<512x128xbf16, #tpu.memory_space<vmem>>, vector<512x128xbf16>,
    return
  }
  func.func @transform_0(%arg0: i32) -> (i32, i32) {
    %c0_i32 = arith.constant 0 : i32
    %c0_i32_0 = arith.constant 0 : i32
    return %arg0, %c0_i32 : i32, i32
  }
  func.func @transform_1(%arg0: i32) -> (i32, i32) {
    %c0_i32 = arith.constant 0 : i32
    %c0_i32_0 = arith.constant 0 : i32
    %c0_i32_1 = arith.constant 0 : i32
    return %c0_i32, %c0_i32_0 : i32, i32
  }
  func.func @transform_2(%arg0: i32) -> (i32, i32) {
    %c0_i32 = arith.constant 0 : i32
    %c0_i32_0 = arith.constant 0 : i32
    %c0_i32_1 = arith.constant 0 : i32
    return %c0_i32, %c0_i32_0 : i32, i32
  }
  func.func @transform_3(%arg0: i32) -> (i32, i32) {
    %c0_i32 = arith.constant 0 : i32
    %c0_i32_0 = arith.constant 0 : i32
    return %arg0, %c0_i32 : i32, i32
  }
  func.func @transform_4(%arg0: i32) -> (i32, i32) {
    %c0_i32 = arith.constant 0 : i32
    %c0_i32_0 = arith.constant 0 : i32
    return %arg0, %c0_i32 : i32, i32
  }
}

</mosaic_0001>

<bundles_post_ra>
// kernel: tpu_custom_call.1
= control target key start
LH: loop header
LB: loop body
LE: loop exit
PB: predicated region body
PF: predicated region fallthrough
CT: control target
= control target key end

     0   :  { %10 = vsyncpa [#allocation3], 0  ;;  %s3274_s0 = inlined_call_operand.hbm [shape: bf16[1024,128], index: 0, kind: input, shape index: {}]   ;;  %s3275_s1 = inlined_call_operand.hbm [shape: bf16[128,256], index: 1, kind: input, shape index: {}]   ;;  %s3276_s2 = inlined_call_operand.vmem [shape: f32[1,128], index: 2, kind: input, shape index: {}]   ;;  %s3277_s3 = inlined_call_operand.hbm [shape: bf16[1024,128], index: 3, kind: output, shape index: {0}]   ;;  %s3278_s4 = inlined_call_operand.hbm [shape: bf16[1024,128], index: 4, kind: output, shape index: {1}]  }
   0x1   :  { %12 = vsyncpa [#allocation3 + $0x1], 0 }
   0x2   :  { %13 = vsyncpa [#allocation6], 0 }
   0x3   :  { %14 = vsyncpa [#allocation4], 0 }
   0x4   :  { %16 = vsyncpa [#allocation4 + $0x1], 0 }
   0x5   :  { %17 = vsyncpa [#allocation9], 0 }
   0x6   :  { %19 = vsyncpa [#allocation9 + $0x1], 0  ;;  %s2853_s15 = smov 0   ;;  %s2855_s16 = smov 0  }
   0x7   :  { %s2857_s17 = smov 0   ;;  %s2859_s18 = smov 0  }
   0x8 LB: > { %s2874_s19 = sadd.s32 4294967295, %s2815_s18   ;;  %s1812_s20 = sadd.s32 4294967294, %s2815_s18   ;;  %s2815_s18 = sphi %s2859_s18, %s3300_s18   ;;  %s2811_s17 = sphi %s2857_s17, %s3299_s17   ;;  %s2807_s16 = sphi %s2855_s16, %s3298_s16   ;;  %s2803_s15 = sphi %s2853_s15, %s3297_s15  }
   0x9   : > { %p45_p0 = scmp.ne.s32.totalorder %s2807_s16, %s2803_s15  ;;  %p3279_p1 = scmp.eq.s32.totalorder %s2874_s19, 0 }
   0xa   : > { %p117_p3 = scmp.eq.s32.totalorder %s1812_s20, 1  ;;  %p1813_p5 = scmp.ge.s32.totalorder %s2815_s18, 1 }
   0xb   : > { %p2883_p4 = por %p3279_p1, %p45_p0  ;;  %p150_p7 = scmp.lt.s32.totalorder %s2815_s18, 3 }
   0xc   : > { %p2888_p6 = por %p117_p3, %p45_p0  ;;  %s2817_s24 = smov [#allocation5]  }
   0xd   : > { %s3283_s21 = scalar_select %p2883_p4, 1, 0 }
   0xe   : > { %s3284_s22 = scalar_select %p2888_p6, 1, 0 }
   0xf   : > { %p2893_p8 = pnand %p1813_p5, %p150_p7  ;;  %s162_s25 = sshll.u32 %s2817_s24, 4  ;;  %s163_s25 = int_to_ptr.vmem [resolvable:$true] %s162_s25 }
  0x10   : > { %s2907_s27 = sadd.s32 1, %s2815_s18   ;;  %s32_s28 = sadd.s32 1, %s2811_s17 }
  0x11   : > { %s3285_s23 = scalar_select %p2893_p8, 1, 0 }
  0x12   : > { %p2548_p9 = pneg %p2893_p8  ;;  %s29_s29 = ssub.s32 %s2815_s18, %s2907_s27 }
  0x13   : > { %s2674_s30 = scalar_lea.vmem %s163_s25, 2048  ;;  %p2682_p5 = scmp.lt.s32.totalorder %s163_s25, %s163_s25 }
  0x14   : > { %p2902_p11 = pnand %p2548_p9, %p3279_p1  ;;  %p2675_p13 = scmp.ne.s32.totalorder %s163_s25, %s2674_s30 }
  0x15   : > { %p2683_p7 = scmp.lt.s32.totalorder %s2674_s30, %s2674_s30 }
  0x16   : > { %p2665_p12 = pneg %p2902_p11 }
  0x17   : > { %p2684_p10 = por %p2683_p7, %p2682_p5 }
  0x18   : > { %p2677_p0 = pnand %p2675_p13, %p2665_p12 }
  0x1a   : > { %p2678_p3 = pneg %p2677_p0 }
  0x1c   : > { %p2685_p2 = pnand %p2684_p10, %p2678_p3 }
  0x1e   : > { %2688 = shalt.err (!%p2685_p2)
}
  0x1f   : > { %s2818_s5 = smov 128   ;;  %s2819_s6 = smov 8  }
  0x20   : > { %2551 = dma.hbm_to_vmem [thread:$0]  (!%p2902_p11), %s3275_s1, 2048, %s163_s25, [#allocation6], %s2818_s5, %s2818_s5, %s2819_s6  }
  0x21   : > { %p30_p9 = scmp.eq.s32.totalorder %s29_s29, 0  ;;  %p39_p12 = scmp.ne.s32.totalorder %s2811_s17, %s2807_s16 }
  0x22   : > { %p40_p10 = scmp.eq.s32.totalorder %s2815_s18, 0  ;;  %p2564_p2 = scmp.lt.s32.totalorder %s2815_s18, 2 }
  0x23   : > { %s2924_s9 = scalar_select %p30_p9, %s2811_s17, %s32_s28  }
  0x24   : > { %p41_p13 = por %p40_p10, %p39_p12  ;;  %p3287_p0 = scmp.eq.s32.totalorder %s2874_s19, 1 }
  0x25   : > { %s179_s11 = sand.u32 1, %s2811_s17   ;;  %s2009_s12 = sshll.u32 %s2815_s18, 12 }
  0x26   : > { %p2928_p3 = por %p3287_p0, %p39_p12  ;;  %s1816_s13 = sshll.u32 %s179_s11, 8 }
  0x27   : > { %s2937_s24 = scalar_lea.hbm %s3274_s0, %s2009_s12  ;;  %s183_s25 = scalar_lea.vmem [#allocation2], %s1816_s13 }
  0x28   : > { %s3288_s10 = scalar_select %p2928_p3, 1, 0 }
  0x29   : > { %s190_s26 = sshll.u32 %s183_s25, 4  ;;  %p2939_p11 = pnand %p2564_p2, %p41_p13  ;;  %s2943_s26 = int_to_ptr.vmem [resolvable:$true] %s190_s26 }
  0x2a   : > { %s2945_s29 = scalar_lea.sflag [#allocation3], %s179_s11  ;;  %s2689_s30 = scalar_lea.hbm %s2937_s24, 4096 }
  0x2b   : > { %p2690_p5 = scmp.ne.s32.totalorder %s2937_s24, %s2689_s30  ;;  %p2691_p7 = pneg %p2939_p11 }
  0x2c   : > { %s2694_s7 = scalar_lea.hbm %s3274_s0, 8192  ;;  %p2695_p10 = scmp.lt.s32.totalorder %s2937_s24, %s3274_s0 }
  0x2d   : > { %p2692_p9 = pnand %p2691_p7, %p2690_p5  ;;  %p2696_p2 = scmp.lt.s32.totalorder %s2694_s7, %s2689_s30 }
  0x2f   : > { %p2693_p12 = pneg %p2692_p9  ;;  %p2697_p13 = por %p2696_p2, %p2695_p10 }
  0x31   : > { %p2698_p0 = pnand %p2697_p13, %p2693_p12 }
  0x33   : > { %2701 = shalt.err (!%p2698_p0)
}
  0x34   : > { %s2702_s11 = scalar_lea.vmem %s2943_s26, 4096  ;;  %s2820_s13 = smov [#allocation2]  }
  0x35   : > { %p2703_p1 = scmp.ne.s32.totalorder %s2943_s26, %s2702_s11  ;;  %s2707_s14 = sshll.u32 %s2820_s13, 4  ;;  %s2708_s14 = int_to_ptr.vmem [resolvable:$false] %s2707_s14 }
  0x36   : > { %s2709_s20 = scalar_lea.vmem %s2708_s14, 8192  ;;  %p2710_p9 = scmp.lt.s32.totalorder %s2943_s26, %s2708_s14 }
  0x37   : > { %p2705_p6 = pnand %p2703_p1, %p2691_p7  ;;  %p2711_p3 = scmp.lt.s32.totalorder %s2709_s20, %s2702_s11 }
  0x39   : > { %p2706_p5 = pneg %p2705_p6  ;;  %p2712_p4 = por %p2711_p3, %p2710_p9 }
  0x3b   : > { %p2713_p8 = pnand %p2712_p4, %p2706_p5 }
  0x3d   : > { %2716 = shalt.err (!%p2713_p8)
}
  0x3e   : > { %s2821_s25 = smov 64   ;;  %s2822_s30 = smov 4  }
  0x3f   : > { %2555 = dma.hbm_to_vmem [thread:$0]  (!%p2939_p11), %s2937_s24, 4096, %s2943_s26, %s2945_s29, %s2821_s25, %s2821_s25, %s2822_s30  }
  0x40   : > { %p3290_p1 = scmp.ne.s32.totalorder %s3285_s23, 0 }
  0x41   : > { %s2969_s5 = sand.u32 (!%p3290_p1), 1, %s2807_s16   ;;  %p3291_p4 = scmp.ne.s32.totalorder (!%p3290_p1), %s3283_s21, 0 }
  0x42   : > { %202 = sbr.rel (%p3290_p1) target bundleno = 467 (0x1d3), region = 32  ;;  %s2972_s6 = sshll.u32 (!%p3290_p1), %s2969_s5, 8 }
  0x43   : > { %s205_s7 = scalar_lea.sflag (!%p3290_p1), [#allocation3], %s2969_s5  ;;  %s2976_s8 = scalar_lea.vmem (!%p3290_p1), [#allocation2], %s2972_s6 }
  0x47   : > { %2786 = dma.done.wait (%p3291_p4), %s205_s7, 4096  }
  0x48   : > { %2788 = vsyncadd (%p3291_p4), %s205_s7, 4294963200  ;;  %p3292_p6 = scmp.eq.s32.totalorder %s2874_s19, 0 }
  0x4a   : > { %2790 = dma.done.wait (%p3292_p6), [#allocation6], 2048   ;;  %p3293_p8 = pmov %p3292_p6 }
  0x4b   : > { %v2823_v0 = vmov 0   ;;  %v2607_v1 = vld [vmem:[#allocation5 + $0x74] ss:$8 sps:$4 sm:$0xff]   ;;  %v2609_v2 = vld [vmem:[#allocation5 + $0x70] ss:$8 sps:$4 sm:$0xff]   ;;  %v2631_v17 = vld [vmem:[%s2976_s8] sm:$0xff]  }
  0x4c   : > { %2792 = vsyncadd (%p3293_p8), [#allocation6], 4294965248  ;;  %630 = vmatprep.mubr.bf16.mxu0 %v2823_v0  ;;  %790 = vmatprep.mubr.bf16.mxu1 %v2823_v0  ;;  %v2610_v3 = vld [vmem:[#allocation5 + $0x64] ss:$8 sps:$4 sm:$0xff]   ;;  %v2612_v4 = vld [vmem:[#allocation5 + $0x60] ss:$8 sps:$4 sm:$0xff]  }
  0x4d   : > { %598 = vmatprep.subr.bf16.mxu0 %v2607_v1  ;;  %2522 = vmatprep.subr.bf16.mxu1 %v2607_v1  ;;  %v2613_v5 = vld [vmem:[#allocation5 + $0x54] ss:$8 sps:$4 sm:$0xff]   ;;  %v2615_v6 = vld [vmem:[#allocation5 + $0x50] ss:$8 sps:$4 sm:$0xff]   ;;  %v2616_v7 = vld [vmem:[#allocation5 + $0x44] ss:$8 sps:$4 sm:$0xff]  }
  0x4e   : > { %599 = vmatpush1.bf16.msra.mxu0 %v2609_v2  ;;  %2530 = vmatpush1.bf16.msra.mxu1 %v2609_v2  ;;  %v2618_v8 = vld [vmem:[#allocation5 + $0x40] ss:$8 sps:$4 sm:$0xff]   ;;  %v2619_v9 = vld [vmem:[#allocation5 + $0x34] ss:$8 sps:$4 sm:$0xff]   ;;  %v2621_v10 = vld [vmem:[#allocation5 + $0x30] ss:$8 sps:$4 sm:$0xff]  }
  0x4f   : > { %600 = vmatprep.subr.bf16.mxu0 %v2610_v3  ;;  %2523 = vmatprep.subr.bf16.mxu1 %v2610_v3  ;;  %v2622_v11 = vld [vmem:[#allocation5 + $0x24] ss:$8 sps:$4 sm:$0xff]   ;;  %v2624_v12 = vld [vmem:[#allocation5 + $0x20] ss:$8 sps:$4 sm:$0xff]   ;;  %v2625_v13 = vld [vmem:[#allocation5 + $0x14] ss:$8 sps:$4 sm:$0xff]  }
  0x50   : > { %v2627_v14 = vld [vmem:[#allocation5 + $0x10] ss:$8 sps:$4 sm:$0xff]   ;;  %v2628_v15 = vld [vmem:[#allocation5 + $0x4] ss:$8 sps:$4 sm:$0xff]   ;;  %v2630_v16 = vld [vmem:[#allocation5] ss:$8 sps:$4 sm:$0xff]  }
  0x51   : > { %v2632_v18 = vld [vmem:[%s2976_s8 + $0x80] sm:$0xff]   ;;  %v2633_v19 = vld [vmem:[%s2976_s8 + $0x8] sm:$0xff]   ;;  %v2635_v21 = vld [vmem:[%s2976_s8 + $0x10] sm:$0xff]   ;;  %s3060_s24 = scalar_lea.vmem [#allocation7], %s2972_s6  ;;  %s3065_s26 = scalar_lea.vmem [#allocation8], %s2972_s6 }
  0x52   : > { %601 = vmatpush1.bf16.msra.mxu0 %v2612_v4  ;;  %2531 = vmatpush1.bf16.msra.mxu1 %v2612_v4  ;;  %v2634_v20 = vld [vmem:[%s2976_s8 + $0x88] sm:$0xff]   ;;  %v2636_v22 = vld [vmem:[%s2976_s8 + $0x90] sm:$0xff]   ;;  %v2637_v23 = vld [vmem:[%s2976_s8 + $0x18] sm:$0xff]   ;;  %s2138_s28 = sshll.u32 %s2874_s19, 12  ;;  %s1681_s29 = sshll.u32 %s3060_s24, 4  ;;  %s3193_s29 = int_to_ptr.vmem [resolvable:$true] %s1681_s29 }
  0x53   : > { %602 = vmatprep.subr.bf16.mxu0 %v2613_v5  ;;  %2524 = vmatprep.subr.bf16.mxu1 %v2613_v5  ;;  %v2638_v24 = vld [vmem:[%s2976_s8 + $0x98] sm:$0xff]   ;;  %v2639_v25 = vld [vmem:[%s2976_s8 + $0x20] sm:$0xff]   ;;  %v2641_v27 = vld [vmem:[%s2976_s8 + $0x28] sm:$0xff]   ;;  %s3190_s19 = scalar_lea.hbm %s3277_s3, %s2138_s28  ;;  %s1697_s13 = sshll.u32 %s3065_s26, 4  ;;  %s3200_s13 = int_to_ptr.vmem [resolvable:$true] %s1697_s13 }
  0x54   : > { %v2640_v26 = vld [vmem:[%s2976_s8 + $0xa0] sm:$0xff]   ;;  %v2642_v28 = vld [vmem:[%s2976_s8 + $0xa8] sm:$0xff]   ;;  %v2643_v29 = vld [vmem:[%s2976_s8 + $0x30] sm:$0xff]   ;;  %s3198_s25 = scalar_lea.hbm %s3278_s4, %s2138_s28  ;;  %s1663_s30 = scalar_lea.sflag [#allocation4], %s2969_s5 }
  0x55   : > { %v2644_v30 = vld [vmem:[%s2976_s8 + $0xb0] sm:$0xff]   ;;  %v2645_v31 = vld [vmem:[%s2976_s8 + $0x38] sm:$0xff]   ;;  %v2647_v33 = vld [vmem:[%s2976_s8 + $0x40] sm:$0xff]   ;;  %s2717_s6 = scalar_lea.vmem %s3193_s29, 4096  ;;  %p3294_p11 = scmp.ne.s32.totalorder %s3288_s10, 0 }
  0x56   : > { %603 = vmatpush1.bf16.msra.mxu0 %v2615_v6  ;;  %2532 = vmatpush1.bf16.msra.mxu1 %v2615_v6  ;;  %v2646_v32 = vld [vmem:[%s2976_s8 + $0xb8] sm:$0xff]   ;;  %v2648_v34 = vld [vmem:[%s2976_s8 + $0xc0] sm:$0xff]   ;;  %v2649_v35 = vld [vmem:[%s2976_s8 + $0x48] sm:$0xff]   ;;  %p2718_p3 = scmp.ne.s32.totalorder %s3193_s29, %s2717_s6  ;;  %s2824_s7 = smov [#allocation7]  }
  0x57   : > { %604 = vmatprep.subr.bf16.mxu0 %v2616_v7  ;;  %2525 = vmatprep.subr.bf16.mxu1 %v2616_v7  ;;  %v2650_v36 = vld [vmem:[%s2976_s8 + $0xc8] sm:$0xff]   ;;  %v2651_v37 = vld [vmem:[%s2976_s8 + $0x50] sm:$0xff]   ;;  %v2653_v39 = vld [vmem:[%s2976_s8 + $0x58] sm:$0xff]  }
  0x58   : > { %v2652_v38 = vld [vmem:[%s2976_s8 + $0xd0] sm:$0xff]   ;;  %v2654_v40 = vld [vmem:[%s2976_s8 + $0xd8] sm:$0xff]   ;;  %v2655_v41 = vld [vmem:[%s2976_s8 + $0x60] sm:$0xff]   ;;  %p2719_p7 = pnand %p2718_p3, %p3294_p11 }
  0x59   : > { %v2656_v42 = vld [vmem:[%s2976_s8 + $0xe0] sm:$0xff]   ;;  %v2657_v43 = vld [vmem:[%s2976_s8 + $0x68] sm:$0xff]   ;;  %v2659_v45 = vld [vmem:[%s2976_s8 + $0x70] sm:$0xff]  }
  0x5a   : > { %605 = vmatpush1.bf16.msra.mxu0 %v2618_v8  ;;  %2533 = vmatpush1.bf16.msra.mxu1 %v2618_v8  ;;  %v2658_v44 = vld [vmem:[%s2976_s8 + $0xe8] sm:$0xff]   ;;  %v2660_v46 = vld [vmem:[%s2976_s8 + $0xf0] sm:$0xff]   ;;  %v2661_v47 = vld [vmem:[%s2976_s8 + $0x78] sm:$0xff]   ;;  %p2720_p12 = pneg %p2719_p7 }
  0x5b   : > { %606 = vmatprep.subr.bf16.mxu0 %v2619_v9  ;;  %2526 = vmatprep.subr.bf16.mxu1 %v2619_v9  ;;  %v2662_v48 = vld [vmem:[%s2976_s8 + $0xf8] sm:$0xff]   ;;  %v3053_v51 = vld [vmem:[%s3276_s2] ss:$0 sm:$0xff]  ;;  %s2721_s8 = sshll.u32 %s2824_s7, 4  ;;  %s2722_s8 = int_to_ptr.vmem [resolvable:$false] %s2721_s8 }
  0x5c   : > { %s2723_s21 = scalar_lea.vmem %s2722_s8, 8192  ;;  %p2724_p10 = scmp.lt.s32.totalorder %s3193_s29, %s2722_s8 }
  0x5d   : > { %p2725_p2 = scmp.lt.s32.totalorder %s2723_s21, %s2717_s6 }
  0x5e   : > { %607 = vmatpush1.bf16.msra.mxu0 %v2621_v10  ;;  %2534 = vmatpush1.bf16.msra.mxu1 %v2621_v10 }
  0x5f   : > { %608 = vmatprep.subr.bf16.mxu0 %v2622_v11  ;;  %2527 = vmatprep.subr.bf16.mxu1 %v2622_v11  ;;  %p2726_p13 = por %p2725_p2, %p2724_p10 }
  0x61   : > { %p2727_p0 = pnand %p2726_p13, %p2720_p12 }
  0x62   : > { %609 = vmatpush1.bf16.msra.mxu0 %v2624_v12  ;;  %2535 = vmatpush1.bf16.msra.mxu1 %v2624_v12 }
  0x63   : > { %610 = vmatprep.subr.bf16.mxu0 %v2625_v13  ;;  %2528 = vmatprep.subr.bf16.mxu1 %v2625_v13 }
  0x66   : > { %611 = vmatpush1.bf16.msra.mxu0 %v2627_v14  ;;  %2536 = vmatpush1.bf16.msra.mxu1 %v2627_v14 }
  0x67   : > { %612 = vmatprep.subr.bf16.mxu0 %v2628_v15  ;;  %2529 = vmatprep.subr.bf16.mxu1 %v2628_v15 }
  0x6a   : > { %613 = vmatpush1.bf16.msra.mxu0 %v2630_v16  ;;  %2537 = vmatpush1.bf16.msra.mxu1 %v2630_v16 }
  0x6d   : > { %631 = vmatmul.mubr.bf16.vlgmr.msra.gmra.mxu0 %v2631_v17  ;;  %791 = vmatmul.mubr.bf16.vlgmr.msra.gmra.mxu1 %v2632_v18 }
  0x6e   : > { %640 = vmatprep.mubr.bf16.mxu0 %v2823_v0  ;;  %800 = vmatprep.mubr.bf16.mxu1 %v2823_v0 }
  0x75   : > { %641 = vmatmul.mubr.bf16.gmra.mxu0 %v2633_v19  ;;  %801 = vmatmul.mubr.bf16.gmra.mxu1 %v2634_v20 }
  0x76   : > { %650 = vmatprep.mubr.bf16.mxu0 %v2823_v0  ;;  %810 = vmatprep.mubr.bf16.mxu1 %v2823_v0 }
  0x7d   : > { %651 = vmatmul.mubr.bf16.gmra.mxu0 %v2635_v21  ;;  %811 = vmatmul.mubr.bf16.gmra.mxu1 %v2636_v22 }
  0x7e   : > { %660 = vmatprep.mubr.bf16.mxu0 %v2823_v0  ;;  %820 = vmatprep.mubr.bf16.mxu1 %v2823_v0 }
  0x85   : > { %661 = vmatmul.mubr.bf16.gmra.mxu0 %v2637_v23  ;;  %821 = vmatmul.mubr.bf16.gmra.mxu1 %v2638_v24 }
  0x86   : > { %670 = vmatprep.mubr.bf16.mxu0 %v2823_v0  ;;  %830 = vmatprep.mubr.bf16.mxu1 %v2823_v0 }
  0x8d   : > { %671 = vmatmul.mubr.bf16.gmra.mxu0 %v2639_v25  ;;  %831 = vmatmul.mubr.bf16.gmra.mxu1 %v2640_v26 }
  0x8e   : > { %680 = vmatprep.mubr.bf16.mxu0 %v2823_v0  ;;  %840 = vmatprep.mubr.bf16.mxu1 %v2823_v0 }
  0x95   : > { %681 = vmatmul.mubr.bf16.gmra.mxu0 %v2641_v27  ;;  %841 = vmatmul.mubr.bf16.gmra.mxu1 %v2642_v28 }
  0x96   : > { %690 = vmatprep.mubr.bf16.mxu0 %v2823_v0  ;;  %850 = vmatprep.mubr.bf16.mxu1 %v2823_v0 }
  0x9d   : > { %691 = vmatmul.mubr.bf16.gmra.mxu0 %v2643_v29  ;;  %851 = vmatmul.mubr.bf16.gmra.mxu1 %v2644_v30 }
  0x9e   : > { %700 = vmatprep.mubr.bf16.mxu0 %v2823_v0  ;;  %860 = vmatprep.mubr.bf16.mxu1 %v2823_v0 }
  0xa5   : > { %701 = vmatmul.mubr.bf16.gmra.mxu0 %v2645_v31  ;;  %861 = vmatmul.mubr.bf16.gmra.mxu1 %v2646_v32 }
  0xa6   : > { %710 = vmatprep.mubr.bf16.mxu0 %v2823_v0  ;;  %870 = vmatprep.mubr.bf16.mxu1 %v2823_v0 }
  0xad   : > { %711 = vmatmul.mubr.bf16.gmra.mxu0 %v2647_v33  ;;  %871 = vmatmul.mubr.bf16.gmra.mxu1 %v2648_v34 }
  0xae   : > { %720 = vmatprep.mubr.bf16.mxu0 %v2823_v0  ;;  %880 = vmatprep.mubr.bf16.mxu1 %v2823_v0 }
  0xb5   : > { %721 = vmatmul.mubr.bf16.gmra.mxu0 %v2649_v35  ;;  %881 = vmatmul.mubr.bf16.gmra.mxu1 %v2650_v36 }
  0xb6   : > { %730 = vmatprep.mubr.bf16.mxu0 %v2823_v0  ;;  %890 = vmatprep.mubr.bf16.mxu1 %v2823_v0 }
  0xbd   : > { %731 = vmatmul.mubr.bf16.gmra.mxu0 %v2651_v37  ;;  %891 = vmatmul.mubr.bf16.gmra.mxu1 %v2652_v38 }
  0xbe   : > { %740 = vmatprep.mubr.bf16.mxu0 %v2823_v0  ;;  %900 = vmatprep.mubr.bf16.mxu1 %v2823_v0 }
  0xc5   : > { %741 = vmatmul.mubr.bf16.gmra.mxu0 %v2653_v39  ;;  %901 = vmatmul.mubr.bf16.gmra.mxu1 %v2654_v40 }
  0xc6   : > { %750 = vmatprep.mubr.bf16.mxu0 %v2823_v0  ;;  %910 = vmatprep.mubr.bf16.mxu1 %v2823_v0 }
  0xcd   : > { %751 = vmatmul.mubr.bf16.gmra.mxu0 %v2655_v41  ;;  %911 = vmatmul.mubr.bf16.gmra.mxu1 %v2656_v42 }
  0xce   : > { %760 = vmatprep.mubr.bf16.mxu0 %v2823_v0  ;;  %920 = vmatprep.mubr.bf16.mxu1 %v2823_v0 }
  0xd5   : > { %761 = vmatmul.mubr.bf16.gmra.mxu0 %v2657_v43  ;;  %921 = vmatmul.mubr.bf16.gmra.mxu1 %v2658_v44 }
  0xd6   : > { %770 = vmatprep.mubr.bf16.mxu0 %v2823_v0  ;;  %930 = vmatprep.mubr.bf16.mxu1 %v2823_v0 }
  0xdd   : > { %771 = vmatmul.mubr.bf16.gmra.mxu0 %v2659_v45  ;;  %931 = vmatmul.mubr.bf16.gmra.mxu1 %v2660_v46 }
  0xde   : > { %780 = vmatprep.mubr.bf16.mxu0 %v2823_v0  ;;  %940 = vmatprep.mubr.bf16.mxu1 %v2823_v0 }
  0xe5   : > { %781 = vmatmul.mubr.bf16.gmra.mxu0 %v2661_v47  ;;  %941 = vmatmul.mubr.bf16.gmra.mxu1 %v2662_v48 }
 0x12d   : > { %v632_v49 = vpop.f32.mrf.mxu0  ;;  %v792_v50 = vpop.f32.mrf.mxu1 }
 0x12e   : > { %v958_v56 = vadd.f32 %v3053_v51, %v632_v49  ;;  %v990_v57 = vadd.f32 %v3053_v51, %v792_v50 }
 0x12f   : > { %v634_v52 = vpop.f32.mrf.mxu0  ;;  %v794_v53 = vpop.f32.mrf.mxu1 }
 0x131   : > { %v636_v54 = vpop.f32.mrf.mxu0  ;;  %v796_v55 = vpop.f32.mrf.mxu1 }
 0x132   : > { %v959_v58 = vadd.f32 %v3053_v51, %v636_v54  ;;  %v991_v59 = vadd.f32 %v3053_v51, %v796_v55 }
 0x133   : > { %v638_v60 = vpop.f32.mrf.mxu0  ;;  %v798_v61 = vpop.f32.mrf.mxu1 }
 0x134   : > { %v2143_v62 = vpack.c.bf16 %v959_v58, %v958_v56  ;;  %v2223_v63 = vpack.c.bf16 %v991_v59, %v990_v57  ;;  %v2303_v0 = vpack.c.bf16 %v638_v60, %v634_v52  ;;  %v2383_v1 = vpack.c.bf16 %v798_v61, %v794_v53 }
 0x135   : > { %v642_v2 = vpop.f32.mrf.mxu0  ;;  %v802_v3 = vpop.f32.mrf.mxu1 }
 0x136   : > { %2144 = vst [vmem:[%s3060_s24] sm:$0xff] %v2143_v62   ;;  %2475 = vst [vmem:[%s3060_s24 + $0x80] sm:$0xff] %v2223_v63   ;;  %v960_v8 = vadd.f32 %v3053_v51, %v642_v2  ;;  %v992_v9 = vadd.f32 %v3053_v51, %v802_v3 }
 0x137   : > { %2304 = vst [vmem:[%s3065_s26] sm:$0xff] %v2303_v0   ;;  %2506 = vst [vmem:[%s3065_s26 + $0x80] sm:$0xff] %v2383_v1   ;;  %v644_v4 = vpop.f32.mrf.mxu0  ;;  %v804_v5 = vpop.f32.mrf.mxu1 }
 0x139   : > { %v646_v6 = vpop.f32.mrf.mxu0  ;;  %v806_v7 = vpop.f32.mrf.mxu1 }
 0x13a   : > { %v961_v10 = vadd.f32 %v3053_v51, %v646_v6  ;;  %v993_v11 = vadd.f32 %v3053_v51, %v806_v7 }
 0x13b   : > { %v648_v12 = vpop.f32.mrf.mxu0  ;;  %v808_v13 = vpop.f32.mrf.mxu1 }
 0x13c   : > { %v2148_v14 = vpack.c.bf16 %v961_v10, %v960_v8  ;;  %v2228_v15 = vpack.c.bf16 %v993_v11, %v992_v9  ;;  %v2308_v16 = vpack.c.bf16 %v648_v12, %v644_v4  ;;  %v2388_v17 = vpack.c.bf16 %v808_v13, %v804_v5 }
 0x13d   : > { %v652_v18 = vpop.f32.mrf.mxu0  ;;  %v812_v19 = vpop.f32.mrf.mxu1 }
 0x13e   : > { %2460 = vst [vmem:[%s3060_s24 + $0x8] sm:$0xff] %v2148_v14   ;;  %2476 = vst [vmem:[%s3060_s24 + $0x88] sm:$0xff] %v2228_v15   ;;  %v962_v24 = vadd.f32 %v3053_v51, %v652_v18  ;;  %v994_v25 = vadd.f32 %v3053_v51, %v812_v19 }
 0x13f   : > { %2491 = vst [vmem:[%s3065_s26 + $0x8] sm:$0xff] %v2308_v16   ;;  %2507 = vst [vmem:[%s3065_s26 + $0x88] sm:$0xff] %v2388_v17   ;;  %v654_v20 = vpop.f32.mrf.mxu0  ;;  %v814_v21 = vpop.f32.mrf.mxu1 }
 0x141   : > { %v656_v22 = vpop.f32.mrf.mxu0  ;;  %v816_v23 = vpop.f32.mrf.mxu1 }
 0x142   : > { %v963_v26 = vadd.f32 %v3053_v51, %v656_v22  ;;  %v995_v27 = vadd.f32 %v3053_v51, %v816_v23 }
 0x143   : > { %v658_v28 = vpop.f32.mrf.mxu0  ;;  %v818_v29 = vpop.f32.mrf.mxu1 }
 0x144   : > { %v2153_v30 = vpack.c.bf16 %v963_v26, %v962_v24  ;;  %v2233_v31 = vpack.c.bf16 %v995_v27, %v994_v25  ;;  %v2313_v32 = vpack.c.bf16 %v658_v28, %v654_v20  ;;  %v2393_v33 = vpack.c.bf16 %v818_v29, %v814_v21 }
 0x145   : > { %v662_v34 = vpop.f32.mrf.mxu0  ;;  %v822_v35 = vpop.f32.mrf.mxu1 }
 0x146   : > { %2461 = vst [vmem:[%s3060_s24 + $0x10] sm:$0xff] %v2153_v30   ;;  %2477 = vst [vmem:[%s3060_s24 + $0x90] sm:$0xff] %v2233_v31   ;;  %v964_v40 = vadd.f32 %v3053_v51, %v662_v34  ;;  %v996_v41 = vadd.f32 %v3053_v51, %v822_v35 }
 0x147   : > { %2492 = vst [vmem:[%s3065_s26 + $0x10] sm:$0xff] %v2313_v32   ;;  %2508 = vst [vmem:[%s3065_s26 + $0x90] sm:$0xff] %v2393_v33   ;;  %v664_v36 = vpop.f32.mrf.mxu0  ;;  %v824_v37 = vpop.f32.mrf.mxu1 }
 0x149   : > { %v666_v38 = vpop.f32.mrf.mxu0  ;;  %v826_v39 = vpop.f32.mrf.mxu1 }
 0x14a   : > { %v965_v42 = vadd.f32 %v3053_v51, %v666_v38  ;;  %v997_v43 = vadd.f32 %v3053_v51, %v826_v39 }
 0x14b   : > { %v668_v44 = vpop.f32.mrf.mxu0  ;;  %v828_v45 = vpop.f32.mrf.mxu1 }
 0x14c   : > { %v2158_v46 = vpack.c.bf16 %v965_v42, %v964_v40  ;;  %v2238_v47 = vpack.c.bf16 %v997_v43, %v996_v41  ;;  %v2318_v48 = vpack.c.bf16 %v668_v44, %v664_v36  ;;  %v2398_v49 = vpack.c.bf16 %v828_v45, %v824_v37 }
 0x14d   : > { %v672_v50 = vpop.f32.mrf.mxu0  ;;  %v832_v52 = vpop.f32.mrf.mxu1 }
 0x14e   : > { %2462 = vst [vmem:[%s3060_s24 + $0x18] sm:$0xff] %v2158_v46   ;;  %2478 = vst [vmem:[%s3060_s24 + $0x98] sm:$0xff] %v2238_v47   ;;  %v966_v57 = vadd.f32 %v3053_v51, %v672_v50  ;;  %v998_v58 = vadd.f32 %v3053_v51, %v832_v52 }
 0x14f   : > { %2493 = vst [vmem:[%s3065_s26 + $0x18] sm:$0xff] %v2318_v48   ;;  %2509 = vst [vmem:[%s3065_s26 + $0x98] sm:$0xff] %v2398_v49   ;;  %v674_v53 = vpop.f32.mrf.mxu0  ;;  %v834_v54 = vpop.f32.mrf.mxu1 }
 0x151   : > { %v676_v55 = vpop.f32.mrf.mxu0  ;;  %v836_v56 = vpop.f32.mrf.mxu1 }
 0x152   : > { %v967_v59 = vadd.f32 %v3053_v51, %v676_v55  ;;  %v999_v60 = vadd.f32 %v3053_v51, %v836_v56 }
 0x153   : > { %v678_v61 = vpop.f32.mrf.mxu0  ;;  %v838_v62 = vpop.f32.mrf.mxu1 }
 0x154   : > { %v2163_v63 = vpack.c.bf16 %v967_v59, %v966_v57  ;;  %v2243_v0 = vpack.c.bf16 %v999_v60, %v998_v58  ;;  %v2323_v1 = vpack.c.bf16 %v678_v61, %v674_v53  ;;  %v2403_v2 = vpack.c.bf16 %v838_v62, %v834_v54 }
 0x155   : > { %v682_v3 = vpop.f32.mrf.mxu0  ;;  %v842_v4 = vpop.f32.mrf.mxu1 }
 0x156   : > { %2463 = vst [vmem:[%s3060_s24 + $0x20] sm:$0xff] %v2163_v63   ;;  %2479 = vst [vmem:[%s3060_s24 + $0xa0] sm:$0xff] %v2243_v0   ;;  %v968_v9 = vadd.f32 %v3053_v51, %v682_v3  ;;  %v1000_v10 = vadd.f32 %v3053_v51, %v842_v4 }
 0x157   : > { %2494 = vst [vmem:[%s3065_s26 + $0x20] sm:$0xff] %v2323_v1   ;;  %2510 = vst [vmem:[%s3065_s26 + $0xa0] sm:$0xff] %v2403_v2   ;;  %v684_v5 = vpop.f32.mrf.mxu0  ;;  %v844_v6 = vpop.f32.mrf.mxu1 }
 0x159   : > { %v686_v7 = vpop.f32.mrf.mxu0  ;;  %v846_v8 = vpop.f32.mrf.mxu1 }
 0x15a   : > { %v969_v11 = vadd.f32 %v3053_v51, %v686_v7  ;;  %v1001_v12 = vadd.f32 %v3053_v51, %v846_v8 }
 0x15b   : > { %v688_v13 = vpop.f32.mrf.mxu0  ;;  %v848_v14 = vpop.f32.mrf.mxu1 }
 0x15c   : > { %v2168_v15 = vpack.c.bf16 %v969_v11, %v968_v9  ;;  %v2248_v16 = vpack.c.bf16 %v1001_v12, %v1000_v10  ;;  %v2328_v17 = vpack.c.bf16 %v688_v13, %v684_v5  ;;  %v2408_v18 = vpack.c.bf16 %v848_v14, %v844_v6 }
 0x15d   : > { %v692_v19 = vpop.f32.mrf.mxu0  ;;  %v852_v20 = vpop.f32.mrf.mxu1 }
 0x15e   : > { %2464 = vst [vmem:[%s3060_s24 + $0x28] sm:$0xff] %v2168_v15   ;;  %2480 = vst [vmem:[%s3060_s24 + $0xa8] sm:$0xff] %v2248_v16   ;;  %v970_v25 = vadd.f32 %v3053_v51, %v692_v19  ;;  %v1002_v26 = vadd.f32 %v3053_v51, %v852_v20 }
 0x15f   : > { %2495 = vst [vmem:[%s3065_s26 + $0x28] sm:$0xff] %v2328_v17   ;;  %2511 = vst [vmem:[%s3065_s26 + $0xa8] sm:$0xff] %v2408_v18   ;;  %v694_v21 = vpop.f32.mrf.mxu0  ;;  %v854_v22 = vpop.f32.mrf.mxu1 }
 0x161   : > { %v696_v23 = vpop.f32.mrf.mxu0  ;;  %v856_v24 = vpop.f32.mrf.mxu1 }
 0x162   : > { %v971_v27 = vadd.f32 %v3053_v51, %v696_v23  ;;  %v1003_v28 = vadd.f32 %v3053_v51, %v856_v24 }
 0x163   : > { %v698_v29 = vpop.f32.mrf.mxu0  ;;  %v858_v30 = vpop.f32.mrf.mxu1 }
 0x164   : > { %v2173_v31 = vpack.c.bf16 %v971_v27, %v970_v25  ;;  %v2253_v32 = vpack.c.bf16 %v1003_v28, %v1002_v26  ;;  %v2333_v33 = vpack.c.bf16 %v698_v29, %v694_v21  ;;  %v2413_v34 = vpack.c.bf16 %v858_v30, %v854_v22 }
 0x165   : > { %v702_v35 = vpop.f32.mrf.mxu0  ;;  %v862_v36 = vpop.f32.mrf.mxu1 }
 0x166   : > { %2465 = vst [vmem:[%s3060_s24 + $0x30] sm:$0xff] %v2173_v31   ;;  %2481 = vst [vmem:[%s3060_s24 + $0xb0] sm:$0xff] %v2253_v32   ;;  %v972_v41 = vadd.f32 %v3053_v51, %v702_v35  ;;  %v1004_v42 = vadd.f32 %v3053_v51, %v862_v36 }
 0x167   : > { %2496 = vst [vmem:[%s3065_s26 + $0x30] sm:$0xff] %v2333_v33   ;;  %2512 = vst [vmem:[%s3065_s26 + $0xb0] sm:$0xff] %v2413_v34   ;;  %v704_v37 = vpop.f32.mrf.mxu0  ;;  %v864_v38 = vpop.f32.mrf.mxu1 }
 0x169   : > { %v706_v39 = vpop.f32.mrf.mxu0  ;;  %v866_v40 = vpop.f32.mrf.mxu1 }
 0x16a   : > { %v973_v43 = vadd.f32 %v3053_v51, %v706_v39  ;;  %v1005_v44 = vadd.f32 %v3053_v51, %v866_v40 }
 0x16b   : > { %v708_v45 = vpop.f32.mrf.mxu0  ;;  %v868_v46 = vpop.f32.mrf.mxu1 }
 0x16c   : > { %v2178_v47 = vpack.c.bf16 %v973_v43, %v972_v41  ;;  %v2258_v48 = vpack.c.bf16 %v1005_v44, %v1004_v42  ;;  %v2338_v49 = vpack.c.bf16 %v708_v45, %v704_v37  ;;  %v2418_v50 = vpack.c.bf16 %v868_v46, %v864_v38 }
 0x16d   : > { %v712_v52 = vpop.f32.mrf.mxu0  ;;  %v872_v53 = vpop.f32.mrf.mxu1 }
 0x16e   : > { %2466 = vst [vmem:[%s3060_s24 + $0x38] sm:$0xff] %v2178_v47   ;;  %2482 = vst [vmem:[%s3060_s24 + $0xb8] sm:$0xff] %v2258_v48   ;;  %v974_v58 = vadd.f32 %v3053_v51, %v712_v52  ;;  %v1006_v59 = vadd.f32 %v3053_v51, %v872_v53 }
 0x16f   : > { %2497 = vst [vmem:[%s3065_s26 + $0x38] sm:$0xff] %v2338_v49   ;;  %2513 = vst [vmem:[%s3065_s26 + $0xb8] sm:$0xff] %v2418_v50   ;;  %v714_v54 = vpop.f32.mrf.mxu0  ;;  %v874_v55 = vpop.f32.mrf.mxu1 }
 0x171   : > { %v716_v56 = vpop.f32.mrf.mxu0  ;;  %v876_v57 = vpop.f32.mrf.mxu1 }
 0x172   : > { %v975_v60 = vadd.f32 %v3053_v51, %v716_v56  ;;  %v1007_v61 = vadd.f32 %v3053_v51, %v876_v57 }
 0x173   : > { %v718_v62 = vpop.f32.mrf.mxu0  ;;  %v878_v63 = vpop.f32.mrf.mxu1 }
 0x174   : > { %v2183_v0 = vpack.c.bf16 %v975_v60, %v974_v58  ;;  %v2263_v1 = vpack.c.bf16 %v1007_v61, %v1006_v59  ;;  %v2343_v2 = vpack.c.bf16 %v718_v62, %v714_v54  ;;  %v2423_v3 = vpack.c.bf16 %v878_v63, %v874_v55 }
 0x175   : > { %v722_v4 = vpop.f32.mrf.mxu0  ;;  %v882_v5 = vpop.f32.mrf.mxu1 }
 0x176   : > { %2467 = vst [vmem:[%s3060_s24 + $0x40] sm:$0xff] %v2183_v0   ;;  %2483 = vst [vmem:[%s3060_s24 + $0xc0] sm:$0xff] %v2263_v1   ;;  %v976_v10 = vadd.f32 %v3053_v51, %v722_v4  ;;  %v1008_v11 = vadd.f32 %v3053_v51, %v882_v5 }
 0x177   : > { %2498 = vst [vmem:[%s3065_s26 + $0x40] sm:$0xff] %v2343_v2   ;;  %2514 = vst [vmem:[%s3065_s26 + $0xc0] sm:$0xff] %v2423_v3   ;;  %v724_v6 = vpop.f32.mrf.mxu0  ;;  %v884_v7 = vpop.f32.mrf.mxu1 }
 0x179   : > { %v726_v8 = vpop.f32.mrf.mxu0  ;;  %v886_v9 = vpop.f32.mrf.mxu1 }
 0x17a   : > { %v977_v12 = vadd.f32 %v3053_v51, %v726_v8  ;;  %v1009_v13 = vadd.f32 %v3053_v51, %v886_v9 }
 0x17b   : > { %v728_v14 = vpop.f32.mrf.mxu0  ;;  %v888_v15 = vpop.f32.mrf.mxu1 }
 0x17c   : > { %v2188_v16 = vpack.c.bf16 %v977_v12, %v976_v10  ;;  %v2268_v17 = vpack.c.bf16 %v1009_v13, %v1008_v11  ;;  %v2348_v18 = vpack.c.bf16 %v728_v14, %v724_v6  ;;  %v2428_v19 = vpack.c.bf16 %v888_v15, %v884_v7 }
 0x17d   : > { %v732_v20 = vpop.f32.mrf.mxu0  ;;  %v892_v21 = vpop.f32.mrf.mxu1 }
 0x17e   : > { %2468 = vst [vmem:[%s3060_s24 + $0x48] sm:$0xff] %v2188_v16   ;;  %2484 = vst [vmem:[%s3060_s24 + $0xc8] sm:$0xff] %v2268_v17   ;;  %v978_v26 = vadd.f32 %v3053_v51, %v732_v20  ;;  %v1010_v27 = vadd.f32 %v3053_v51, %v892_v21 }
 0x17f   : > { %2499 = vst [vmem:[%s3065_s26 + $0x48] sm:$0xff] %v2348_v18   ;;  %2515 = vst [vmem:[%s3065_s26 + $0xc8] sm:$0xff] %v2428_v19   ;;  %v734_v22 = vpop.f32.mrf.mxu0  ;;  %v894_v23 = vpop.f32.mrf.mxu1 }
 0x181   : > { %v736_v24 = vpop.f32.mrf.mxu0  ;;  %v896_v25 = vpop.f32.mrf.mxu1 }
 0x182   : > { %v979_v28 = vadd.f32 %v3053_v51, %v736_v24  ;;  %v1011_v29 = vadd.f32 %v3053_v51, %v896_v25 }
 0x183   : > { %v738_v30 = vpop.f32.mrf.mxu0  ;;  %v898_v31 = vpop.f32.mrf.mxu1 }
 0x184   : > { %v2193_v32 = vpack.c.bf16 %v979_v28, %v978_v26  ;;  %v2273_v33 = vpack.c.bf16 %v1011_v29, %v1010_v27  ;;  %v2353_v34 = vpack.c.bf16 %v738_v30, %v734_v22  ;;  %v2433_v35 = vpack.c.bf16 %v898_v31, %v894_v23 }
 0x185   : > { %v742_v36 = vpop.f32.mrf.mxu0  ;;  %v902_v37 = vpop.f32.mrf.mxu1 }
 0x186   : > { %2469 = vst [vmem:[%s3060_s24 + $0x50] sm:$0xff] %v2193_v32   ;;  %2485 = vst [vmem:[%s3060_s24 + $0xd0] sm:$0xff] %v2273_v33   ;;  %v980_v42 = vadd.f32 %v3053_v51, %v742_v36  ;;  %v1012_v43 = vadd.f32 %v3053_v51, %v902_v37 }
 0x187   : > { %2500 = vst [vmem:[%s3065_s26 + $0x50] sm:$0xff] %v2353_v34   ;;  %2516 = vst [vmem:[%s3065_s26 + $0xd0] sm:$0xff] %v2433_v35   ;;  %v744_v38 = vpop.f32.mrf.mxu0  ;;  %v904_v39 = vpop.f32.mrf.mxu1 }
 0x189   : > { %v746_v40 = vpop.f32.mrf.mxu0  ;;  %v906_v41 = vpop.f32.mrf.mxu1 }
 0x18a   : > { %v981_v44 = vadd.f32 %v3053_v51, %v746_v40  ;;  %v1013_v45 = vadd.f32 %v3053_v51, %v906_v41 }
 0x18b   : > { %v748_v46 = vpop.f32.mrf.mxu0  ;;  %v908_v47 = vpop.f32.mrf.mxu1 }
 0x18c   : > { %v2198_v48 = vpack.c.bf16 %v981_v44, %v980_v42  ;;  %v2278_v49 = vpack.c.bf16 %v1013_v45, %v1012_v43  ;;  %v2358_v50 = vpack.c.bf16 %v748_v46, %v744_v38  ;;  %v2438_v52 = vpack.c.bf16 %v908_v47, %v904_v39 }
 0x18d   : > { %v752_v53 = vpop.f32.mrf.mxu0  ;;  %v912_v54 = vpop.f32.mrf.mxu1 }
 0x18e   : > { %2470 = vst [vmem:[%s3060_s24 + $0x58] sm:$0xff] %v2198_v48   ;;  %2486 = vst [vmem:[%s3060_s24 + $0xd8] sm:$0xff] %v2278_v49   ;;  %v982_v59 = vadd.f32 %v3053_v51, %v752_v53  ;;  %v1014_v60 = vadd.f32 %v3053_v51, %v912_v54 }
 0x18f   : > { %2501 = vst [vmem:[%s3065_s26 + $0x58] sm:$0xff] %v2358_v50   ;;  %2517 = vst [vmem:[%s3065_s26 + $0xd8] sm:$0xff] %v2438_v52   ;;  %v754_v55 = vpop.f32.mrf.mxu0  ;;  %v914_v56 = vpop.f32.mrf.mxu1 }
 0x191   : > { %v756_v57 = vpop.f32.mrf.mxu0  ;;  %v916_v58 = vpop.f32.mrf.mxu1 }
 0x192   : > { %v983_v61 = vadd.f32 %v3053_v51, %v756_v57  ;;  %v1015_v62 = vadd.f32 %v3053_v51, %v916_v58 }
 0x193   : > { %v758_v63 = vpop.f32.mrf.mxu0  ;;  %v918_v0 = vpop.f32.mrf.mxu1 }
 0x194   : > { %v2203_v1 = vpack.c.bf16 %v983_v61, %v982_v59  ;;  %v2283_v2 = vpack.c.bf16 %v1015_v62, %v1014_v60  ;;  %v2363_v3 = vpack.c.bf16 %v758_v63, %v754_v55  ;;  %v2443_v4 = vpack.c.bf16 %v918_v0, %v914_v56 }
 0x195   : > { %v762_v5 = vpop.f32.mrf.mxu0  ;;  %v922_v6 = vpop.f32.mrf.mxu1 }
 0x196   : > { %2471 = vst [vmem:[%s3060_s24 + $0x60] sm:$0xff] %v2203_v1   ;;  %2487 = vst [vmem:[%s3060_s24 + $0xe0] sm:$0xff] %v2283_v2   ;;  %v984_v11 = vadd.f32 %v3053_v51, %v762_v5  ;;  %v1016_v12 = vadd.f32 %v3053_v51, %v922_v6 }
 0x197   : > { %2502 = vst [vmem:[%s3065_s26 + $0x60] sm:$0xff] %v2363_v3   ;;  %2518 = vst [vmem:[%s3065_s26 + $0xe0] sm:$0xff] %v2443_v4   ;;  %v764_v7 = vpop.f32.mrf.mxu0  ;;  %v924_v8 = vpop.f32.mrf.mxu1 }
 0x199   : > { %v766_v9 = vpop.f32.mrf.mxu0  ;;  %v926_v10 = vpop.f32.mrf.mxu1 }
 0x19a   : > { %v985_v13 = vadd.f32 %v3053_v51, %v766_v9  ;;  %v1017_v14 = vadd.f32 %v3053_v51, %v926_v10 }
 0x19b   : > { %v768_v15 = vpop.f32.mrf.mxu0  ;;  %v928_v16 = vpop.f32.mrf.mxu1 }
 0x19c   : > { %v2208_v17 = vpack.c.bf16 %v985_v13, %v984_v11  ;;  %v2288_v18 = vpack.c.bf16 %v1017_v14, %v1016_v12  ;;  %v2368_v19 = vpack.c.bf16 %v768_v15, %v764_v7  ;;  %v2448_v20 = vpack.c.bf16 %v928_v16, %v924_v8 }
 0x19d   : > { %v772_v21 = vpop.f32.mrf.mxu0  ;;  %v932_v22 = vpop.f32.mrf.mxu1 }
 0x19e   : > { %2472 = vst [vmem:[%s3060_s24 + $0x68] sm:$0xff] %v2208_v17   ;;  %2488 = vst [vmem:[%s3060_s24 + $0xe8] sm:$0xff] %v2288_v18   ;;  %v986_v27 = vadd.f32 %v3053_v51, %v772_v21  ;;  %v1018_v28 = vadd.f32 %v3053_v51, %v932_v22 }
 0x19f   : > { %2503 = vst [vmem:[%s3065_s26 + $0x68] sm:$0xff] %v2368_v19   ;;  %2519 = vst [vmem:[%s3065_s26 + $0xe8] sm:$0xff] %v2448_v20   ;;  %v774_v23 = vpop.f32.mrf.mxu0  ;;  %v934_v24 = vpop.f32.mrf.mxu1 }
 0x1a1   : > { %v776_v25 = vpop.f32.mrf.mxu0  ;;  %v936_v26 = vpop.f32.mrf.mxu1 }
 0x1a2   : > { %v987_v29 = vadd.f32 %v3053_v51, %v776_v25  ;;  %v1019_v30 = vadd.f32 %v3053_v51, %v936_v26 }
 0x1a3   : > { %v778_v31 = vpop.f32.mrf.mxu0  ;;  %v938_v32 = vpop.f32.mrf.mxu1 }
 0x1a4   : > { %v2213_v33 = vpack.c.bf16 %v987_v29, %v986_v27  ;;  %v2293_v34 = vpack.c.bf16 %v1019_v30, %v1018_v28  ;;  %v2373_v35 = vpack.c.bf16 %v778_v31, %v774_v23  ;;  %v2453_v36 = vpack.c.bf16 %v938_v32, %v934_v24 }
 0x1a5   : > { %v782_v37 = vpop.f32.mrf.mxu0  ;;  %v942_v38 = vpop.f32.mrf.mxu1 }
 0x1a6   : > { %2473 = vst [vmem:[%s3060_s24 + $0x70] sm:$0xff] %v2213_v33   ;;  %2489 = vst [vmem:[%s3060_s24 + $0xf0] sm:$0xff] %v2293_v34   ;;  %v988_v43 = vadd.f32 %v3053_v51, %v782_v37  ;;  %v1020_v44 = vadd.f32 %v3053_v51, %v942_v38 }
 0x1a7   : > { %2504 = vst [vmem:[%s3065_s26 + $0x70] sm:$0xff] %v2373_v35   ;;  %2520 = vst [vmem:[%s3065_s26 + $0xf0] sm:$0xff] %v2453_v36   ;;  %v784_v39 = vpop.f32.mrf.mxu0  ;;  %v944_v40 = vpop.f32.mrf.mxu1 }
 0x1a9   : > { %v786_v41 = vpop.f32.mrf.mxu0  ;;  %v946_v42 = vpop.f32.mrf.mxu1 }
 0x1aa   : > { %v989_v45 = vadd.f32 %v3053_v51, %v786_v41  ;;  %v1021_v46 = vadd.f32 %v3053_v51, %v946_v42 }
 0x1ab   : > { %v788_v47 = vpop.f32.mrf.mxu0  ;;  %v948_v48 = vpop.f32.mrf.mxu1 }
 0x1ac   : > { %v2218_v49 = vpack.c.bf16 %v989_v45, %v988_v43  ;;  %v2298_v50 = vpack.c.bf16 %v1021_v46, %v1020_v44  ;;  %v2378_v52 = vpack.c.bf16 %v788_v47, %v784_v39  ;;  %v2458_v53 = vpack.c.bf16 %v948_v48, %v944_v40 }
 0x1ae   : > { %2474 = vst [vmem:[%s3060_s24 + $0x78] sm:$0xff] %v2218_v49   ;;  %2490 = vst [vmem:[%s3060_s24 + $0xf8] sm:$0xff] %v2298_v50  }
 0x1af   : > { %2505 = vst [vmem:[%s3065_s26 + $0x78] sm:$0xff] %v2378_v52   ;;  %2521 = vst [vmem:[%s3065_s26 + $0xf8] sm:$0xff] %v2458_v53  }
 0x1b0   : > { %2730 = shalt.err (!%p2727_p0)
}
 0x1b1   : > { %s2731_s23 = scalar_lea.hbm %s3190_s19, 4096  ;;  %s2735_s28 = scalar_lea.hbm %s3277_s3, 8192 }
 0x1b2   : > { %p2732_p5 = scmp.ne.s32.totalorder %s3190_s19, %s2731_s23  ;;  %p2736_p4 = scmp.lt.s32.totalorder %s3190_s19, %s3277_s3 }
 0x1b3   : > { %p2737_p6 = scmp.lt.s32.totalorder %s2735_s28, %s2731_s23 }
 0x1b4   : > { %p2733_p9 = pnand %p2732_p5, %p3294_p11 }
 0x1b5   : > { %p2738_p8 = por %p2737_p6, %p2736_p4 }
 0x1b6   : > { %p2734_p1 = pneg %p2733_p9 }
 0x1b8   : > { %p2739_p3 = pnand %p2738_p8, %p2734_p1 }
 0x1ba   : > { %2742 = shalt.err (!%p2739_p3)
}
 0x1bb   : > { %s2825_s14 = smov 64   ;;  %s2826_s20 = smov 4  }
 0x1bc   : > { %2544 = dma.vmem_to_hbm [thread:$0]  (%p3294_p11), %s3193_s29, 4096, %s3190_s19, %s1663_s30, %s2825_s14, %s2825_s14, %s2826_s20  }
 0x1bd   : > { %s1668_s6 = scalar_lea.sflag [#allocation9], %s2969_s5  ;;  %s2743_s7 = scalar_lea.vmem %s3200_s13, 4096 }
 0x1be   : > { %p2744_p7 = scmp.ne.s32.totalorder %s3200_s13, %s2743_s7  ;;  %s2827_s8 = smov [#allocation8]  }
 0x1bf   : > { %s2747_s21 = sshll.u32 %s2827_s8, 4  ;;  %s2748_s21 = int_to_ptr.vmem [resolvable:$false] %s2747_s21 }
 0x1c0   : > { %p2745_p12 = pnand %p2744_p7, %p3294_p11  ;;  %s2749_s23 = scalar_lea.vmem %s2748_s21, 8192 }
 0x1c1   : > { %p2750_p2 = scmp.lt.s32.totalorder %s3200_s13, %s2748_s21  ;;  %p2751_p13 = scmp.lt.s32.totalorder %s2749_s23, %s2743_s7 }
 0x1c2   : > { %p2746_p10 = pneg %p2745_p12 }
 0x1c3   : > { %p2752_p0 = por %p2751_p13, %p2750_p2 }
 0x1c5   : > { %p2753_p5 = pnand %p2752_p0, %p2746_p10 }
 0x1c7   : > { %2756 = shalt.err (!%p2753_p5)
}
 0x1c8   : > { %s2757_s29 = scalar_lea.hbm %s3198_s25, 4096  ;;  %s2761_s30 = scalar_lea.hbm %s3278_s4, 8192 }
 0x1c9   : > { %p2758_p9 = scmp.ne.s32.totalorder %s3198_s25, %s2757_s29  ;;  %p2762_p6 = scmp.lt.s32.totalorder %s3198_s25, %s3278_s4 }
 0x1ca   : > { %p2763_p8 = scmp.lt.s32.totalorder %s2761_s30, %s2757_s29 }
 0x1cb   : > { %p2759_p1 = pnand %p2758_p9, %p3294_p11 }
 0x1cc   : > { %p2764_p3 = por %p2763_p8, %p2762_p6 }
 0x1cd   : > { %p2760_p4 = pneg %p2759_p1 }
 0x1cf   : > { %p2765_p7 = pnand %p2764_p3, %p2760_p4 }
 0x1d1   : > { %2768 = shalt.err (!%p2765_p7)
}
 0x1d2   : > { %2545 = dma.vmem_to_hbm [thread:$0]  (%p3294_p11), %s3200_s13, 4096, %s3198_s25, %s1668_s6, %s2825_s14, %s2825_s14, %s2826_s20  }
 0x1d3 PF: > { %s1712_s28 = sand.u32 1, %s2803_s15   ;;  %p3295_p12 = scmp.ne.s32.totalorder %s3284_s22, 0 }
 0x1d4   : > { %p3296_p10 = scmp.ge.s32.totalorder %s2815_s18, 2  ;;  %s1713_s12 = scalar_lea.sflag [#allocation4], %s1712_s28 }
 0x1d6   : > { %p2557_p2 = pnand %p3296_p10, %p3295_p12 }
 0x1d8   : > { %p2558_p13 = pneg %p2557_p2 }
 0x1da   : > { %2794 = dma.done.wait (%p2558_p13), %s1713_s12, 4096  }
 0x1db   : > { %2796 = vsyncadd (%p2558_p13), %s1713_s12, 4294963200  ;;  %s1722_s11 = scalar_lea.sflag [#allocation9], %s1712_s28 }
 0x1dc   : > { %2798 = dma.done.wait (%p2558_p13), %s1722_s11, 4096  }
 0x1dd   : > { %2800 = vsyncadd (%p2558_p13), %s1722_s11, 4294963200  ;;  %p22_p11 = scmp.ge.s32.totalorder %s2907_s27, 4   ;;  %s3297_s15 = smov %s2807_s16 }
 0x1de   : > { %s3298_s16 = smov %s2811_s17  ;;  %s3299_s17 = smov %s2924_s9 }
 0x1df   : > { %s3300_s18 = smov %s2907_s27  ;;  %24 = sbr.rel (!%p22_p11) target bundleno = 8 (0x8), region = 98 }
 0x1e4   :  { %1727 = vsyncpa [#allocation3], 1 }
 0x1e5   :  { %1729 = vsyncpa [#allocation3 + $0x1], 1 }
 0x1e6   :  { %1730 = vsyncpa [#allocation6], 1 }
 0x1e7   :  { %1731 = vsyncpa [#allocation4], 1 }
 0x1e8   :  { %1733 = vsyncpa [#allocation4 + $0x1], 1 }
 0x1e9   :  { %1734 = vsyncpa [#allocation9], 1 }
 0x1ea   :  { %1736 = vsyncpa [#allocation9 + $0x1], 1 }

</bundles_post_ra>
